<compile_context>
chip_gen: v5e
topology: v5e:2x2
jax: 0.10.0
libtpu: 0.0.40
codegen_flags: <defaults>
</compile_context>

<pallas_src>
import jax
import jax.numpy as jnp
from jax.experimental import pallas as pl
from jax.experimental.pallas import tpu as pltpu


# ---------------------------------------------------------------------------
# Zero-traffic identity: output aliases input, kernel body is a no-op.
# ---------------------------------------------------------------------------
def _alias_identity_kernel(x_ref, o_ref):
    del x_ref
    # The output buffer IS the input buffer (input_output_aliases={0: 0}), so
    # there is nothing to move.  touch() pins a fake read/write dependency on
    # the aliased output so the call is ordered and not elided.
    pltpu.touch(o_ref)


def _alias_identity(x):
    return pl.pallas_call(
        _alias_identity_kernel,
        out_shape=jax.ShapeDtypeStruct(x.shape, x.dtype),
        in_specs=[pl.BlockSpec(memory_space=pl.ANY)],    # stay in HBM, no DMA
        out_specs=pl.BlockSpec(memory_space=pl.ANY),
        input_output_aliases={0: 0},
        compiler_params=pltpu.CompilerParams(has_side_effects=True),
    )(x)


# ---------------------------------------------------------------------------
# Safety-net tiled copy (only used if the aliased no-op path fails to lower).
# ---------------------------------------------------------------------------
_TARGET_TILE_BYTES = 2 * 1024 * 1024    # ~2 MiB/tile: <2% off the roofline knee
                                        # and small leaves still split into >=2
                                        # blocks so both v7x TCs issue DMAs.
_MAX_COLS = 4096                        # lane-dense width cap (multiple of 128)
_VMEM_LIMIT_BYTES = 32 * 1024 * 1024    # safe on v5e/v6e (128 MiB) and v7x (64 MiB)
_MIN_PALLAS_BYTES = 1 * 1024 * 1024     # below this, launch overhead dominates


def _copy_kernel(x_ref, o_ref):
    o_ref[...] = x_ref[...]


def _sublane_multiple(dtype):
    """Dtype-aware sublane granularity: 8 for f32, 16 for bf16, 32 for int8."""
    itemsize = jnp.dtype(dtype).itemsize
    return max(8, 32 // max(itemsize, 1))


def _as_2d(x):
    """Reshape to a lane/sublane-dense (rows, cols) slab without padding.

    Returns None when no dense factorization exists (caller then falls back
    to a plain identity — exact for this module).
    """
    total = x.size
    sub = _sublane_multiple(x.dtype)
    # Preferred: lane-dense columns (multiple of 128 dividing total) so stores
    # are unmasked full-lane vst.
    for c in range(_MAX_COLS, 127, -128):
        if total % c == 0:
            return x.reshape(total // c, c)
    # Otherwise: sublane-dense rows (multiple of `sub`), ragged lane dim.
    # Pallas masks only the last lane block; never a 1-sublane layout (which
    # would make the copy vst-slot-bound, below the HBM roofline on v5e/v6e).
    for r in range(sub * 512, sub - 1, -sub):
        if total % r == 0:
            return x.reshape(r, total // r)
    return None


def _tiled_copy_2d(x2d):
    """Tiled identity copy of a lane/sublane-dense 2-D slab."""
    R, C = x2d.shape
    itemsize = jnp.dtype(x2d.dtype).itemsize
    sub = _sublane_multiple(x2d.dtype)

    row_bytes = max(C * itemsize, 1)
    tile_rows = max(sub, (_TARGET_TILE_BYTES // row_bytes) // sub * sub)
    if tile_rows >= R:
        # Leaf fits one tile: split it in two anyway so a 2-TC chip (v7x)
        # keeps both cores busy; per-tile efficiency loss is <2%.
        half = (R // 2) // sub * sub
        tile_rows = half if half >= sub else R

    grid = (pl.cdiv(R, tile_rows),)
    block = (tile_rows, C)   # tile_rows multiple of sub (or full R); C is
                             # either a multiple of 128 or the full extent.

    return pl.pallas_call(
        _copy_kernel,
        out_shape=jax.ShapeDtypeStruct((R, C), x2d.dtype),
        grid_spec=pltpu.PrefetchScalarGridSpec(
            num_scalar_prefetch=0,
            grid=grid,
            in_specs=[pl.BlockSpec(block, lambda i: (i, 0))],
            out_specs=pl.BlockSpec(block, lambda i: (i, 0)),
        ),
        compiler_params=pltpu.CompilerParams(
            dimension_semantics=("parallel",),
            vmem_limit_bytes=_VMEM_LIMIT_BYTES,
        ),
    )(x2d)


def _fallback_copy(x):
    x2d = _as_2d(x)
    if x2d is None:
        return x   # no dense factorization (e.g. prime size): exact identity
    itemsize = jnp.dtype(x.dtype).itemsize
    sub = _sublane_multiple(x.dtype)
    # Minimal block is (sub, C); bail to a plain identity if even that would
    # blow the VMEM budget when double-buffered for input + output.
    if 4 * sub * x2d.shape[1] * itemsize > _VMEM_LIMIT_BYTES:
        return x
    return _tiled_copy_2d(x2d).reshape(x.shape)


# ---------------------------------------------------------------------------
# Public wrapper: Identity_Neck.forward
# ---------------------------------------------------------------------------
def _pallas_identity(x):
    try:
        return _alias_identity(x)          # zero-traffic main path
    except Exception:                       # pragma: no cover - safety net
        return _fallback_copy(x)            # proven tiled-copy path


def identity_neck(inputs, *, min_pallas_bytes=_MIN_PALLAS_BYTES):
    """Pallas equivalent of Identity_Neck.forward.

    Accepts a single array or any pytree of arrays (tuple / list / dict of
    multi-scale features) and returns the same structure unchanged.  Leaves
    smaller than `min_pallas_bytes` skip Pallas entirely (launch overhead
    dominates there); larger leaves flow through a zero-copy aliased
    pallas_call.
    """
    def one(x):
        nbytes = x.size * jnp.dtype(x.dtype).itemsize
        if x.size == 0 or nbytes < min_pallas_bytes:
            return x
        return _pallas_identity(x)

    return jax.tree_util.tree_map(one, inputs)


if __name__ == "__main__":
    key = jax.random.PRNGKey(0)
    # Small NCHW feature map consistent with an mmcls neck input.
    x = jax.random.normal(key, (2, 4, 16, 16), dtype=jnp.float32)

    # Force the Pallas path even for this small leaf so the kernel runs once.
    y = identity_neck(x, min_pallas_bytes=0)
    y = jax.block_until_ready(y)
    assert y.shape == x.shape and y.dtype == x.dtype
    assert bool(jnp.array_equal(y, x))

    # Tuple-of-features path (common for mmcls necks) with the default
    # small-leaf bypass — semantically identical, near-zero cost.
    x2 = jax.random.normal(jax.random.PRNGKey(1), (2, 8, 8, 8), dtype=jnp.float32)
    xs = (x, x2)
    ys = identity_neck(xs)
    ys = jax.block_until_ready(ys)
    assert isinstance(ys, tuple) and len(ys) == 2
    assert all(bool(jnp.array_equal(a, b)) for a, b in zip(ys, xs))

    print("KERNEL_OK")
</pallas_src>

<mosaic_0001>
module attributes {stable_mosaic.version = 11 : i64} {
  func.func @_alias_identity_kernel(%arg0: memref<2x4x16x16xf32, #tpu.memory_space<any>>, %arg1: memref<2x4x16x16xf32, #tpu.memory_space<any>>) attributes {dimension_semantics = [], scalar_prefetch = 0 : i64, scratch_operands = 0 : i64, tpu.core_type = #tpu.core_type<tc>} {
    return
  }
}

module attributes {stable_mosaic.version = 11 : i64} {
  func.func @_copy_kernel(%arg0: i32, %arg1: memref<1x2048xf32, #tpu.memory_space<vmem>>, %arg2: memref<1x2048xf32, #tpu.memory_space<vmem>>) attributes {dimension_semantics = [#tpu.dimension_semantics<parallel>], iteration_bounds = array<i64: 1>, scalar_prefetch = 0 : i64, scratch_operands = 0 : i64, tpu.core_type = #tpu.core_type<tc>, window_params = [{transform_indices = @transform_0, window_bounds = array<i64: 1, 2048>}, {transform_indices = @transform_1, window_bounds = array<i64: 1, 2048>}]} {
    %c0 = arith.constant 0 : index
    %c0_0 = arith.constant 0 : index
    %0 = vector.load %arg1[%c0, %c0_0] : memref<1x2048xf32, #tpu.memory_space<vmem>>, vector<1x2048xf32>
    %c0_1 = arith.constant 0 : index
    %c0_2 = arith.constant 0 : index
    %1 = vector.load %arg2[%c0_1, %c0_2] : memref<1x2048xf32, #tpu.memory_space<vmem>>, vector<1x2048xf32>
    tpu.vector_store %arg2[%c0_1, %c0_2], %0 {strides = array<i32>} : memref<1x2048xf32, #tpu.memory_space<vmem>>, vector<1x2048xf32>,
    return
  }
  func.func @transform_0(%arg0: i32) -> (i32, i32) {
    %c0_i32 = arith.constant 0 : i32
    %c0_i32_0 = arith.constant 0 : i32
    return %arg0, %c0_i32 : i32, i32
  }
  func.func @transform_1(%arg0: i32) -> (i32, i32) {
    %c0_i32 = arith.constant 0 : i32
    %c0_i32_0 = arith.constant 0 : i32
    return %arg0, %c0_i32 : i32, i32
  }
}

</mosaic_0001>

<bundles_post_ra>
// kernel: tpu_custom_call.1
= control target key start
LH: loop header
LB: loop body
LE: loop exit
PB: predicated region body
PF: predicated region fallthrough
CT: control target
= control target key end

     0   :  { %s16_s0 = inlined_call_operand.hbm [shape: f32[2,4,16,16], index: 0, kind: input, shape index: {}, may-alias: {0,1}]   ;;  %s17_s1 = inlined_call_operand.hbm [shape: f32[2,4,16,16], index: 1, kind: output, shape index: {}, may-alias: {0,1}]  }

// kernel: tpu_custom_call.1
= control target key start
LH: loop header
LB: loop body
LE: loop exit
PB: predicated region body
PF: predicated region fallthrough
CT: control target
= control target key end

     0   :  { %6 = vsyncpa [#allocation3], 0  ;;  %s116_s0 = inlined_call_operand.hbm [shape: f32[1,2048], index: 0, kind: input, shape index: {}]   ;;  %s117_s1 = inlined_call_operand.hbm [shape: f32[1,2048], index: 1, kind: output, shape index: {}]  }
   0x1   :  { %7 = vsyncpa [#allocation4], 0  ;;  %s13_s8 = sshll.u32 %s116_s0, 4  ;;  %s98_s9 = smov [#allocation2]   ;;  %s14_s8 = int_to_ptr.hbm [resolvable:$true] %s13_s8 }
   0x2   :  { %s15_s10 = sshll.u32 %s98_s9, 4  ;;  %s16_s10 = int_to_ptr.vmem [resolvable:$true] %s15_s10 }
   0x3   :  { %18 = dma.hbm_to_vmem [thread:$0]  %s14_s8, 256, %s16_s10, [#allocation3]  }
   0x4   :  { %94 = dma.done.wait [#allocation3], 256  }
   0x5   :  { %95 = vsyncadd [#allocation3], 4294967040  ;;  %s99_s11 = smov [#allocation5]   ;;  %s34_s15 = sshll.u32 %s117_s1, 4  ;;  %v23_v0 = vld [vmem:[#allocation2] sm:$0xff]  ;;  %v24_v1 = vld [vmem:[#allocation2 + $0x8] sm:$0xff]  ;;  %s35_s15 = int_to_ptr.hbm [resolvable:$true] %s34_s15 }
   0x6   :  { %s32_s12 = sshll.u32 %s99_s11, 4  ;;  %25 = vst [vmem:[#allocation5] sm:$0xff] %v23_v0  ;;  %s33_s12 = int_to_ptr.vmem [resolvable:$true] %s32_s12 }
   0x7   :  { %26 = vst [vmem:[#allocation5 + $0x8] sm:$0xff] %v24_v1 }
   0x8   :  { %37 = dma.vmem_to_hbm [thread:$0]  %s33_s12, 256, %s35_s15, [#allocation4]  }
   0x9   :  { %96 = dma.done.wait [#allocation4], 256  }
   0xa   :  { %97 = vsyncadd [#allocation4], 4294967040 }
   0xb   :  { %42 = vsyncpa [#allocation3], 1 }
   0xc   :  { %43 = vsyncpa [#allocation4], 1 }

</bundles_post_ra>
